<compile_context>
chip_gen: v7x
topology: tpu7x:2x2x1
jax: 0.10.0
libtpu: 0.0.40
codegen_flags: <defaults>
</compile_context>

<pallas_src>
import jax
import jax.numpy as jnp
from jax.experimental import pallas as pl
from jax.experimental.pallas import tpu as pltpu


# ---------------------------------------------------------------------------
# Helpers
# ---------------------------------------------------------------------------
def _round_up(v, m):
    return ((v + m - 1) // m) * m


_VMEM_BUDGET = None


def _vmem_budget_bytes():
    """Per-generation scoped-VMEM budget (v5e/v6e: 64 MiB of 128; v7x: 32 of 64)."""
    global _VMEM_BUDGET
    if _VMEM_BUDGET is None:
        cap = None
        try:
            cap = getattr(pltpu.get_tpu_info(), "vmem_capacity_bytes", None)
        except Exception:
            cap = None
        if not cap:
            cap = 64 * 1024 * 1024  # conservative default: v7x physical per-TC
        _VMEM_BUDGET = int(min(cap // 2, 96 * 1024 * 1024))
    return _VMEM_BUDGET


# ---------------------------------------------------------------------------
# Unfused fallback kernel: y = x @ W^T + b  (nn.Linear hot path)
# ---------------------------------------------------------------------------
def _linear_bias_kernel(x_ref, w_ref, b_ref, o_ref):
    # x_ref: (tm, K) compute dtype   w_ref: (K, N) compute dtype (resident)
    # b_ref: (1, N) f32 (resident)   o_ref: (tm, N) out dtype
    acc = jnp.dot(x_ref[...], w_ref[...], preferred_element_type=jnp.float32)
    o_ref[...] = (acc + b_ref[...]).astype(o_ref.dtype)  # bias add stays in f32 (v5e: no bf16 VALU)


def _pick_row_tile(M, K, N, in_itemsize, out_itemsize, w_itemsize, tm_max=2048):
    """Row tile: as large as the VMEM budget allows, a multiple of 16 (bf16
    sublane packing), capped so the grid has >=4 steps when M allows
    (>=2 steps per v7x TensorCore for DMA/compute overlap)."""
    budget = _vmem_budget_bytes()
    fixed = 2 * K * N * w_itemsize + 2 * 128 * N * 4 + (2 << 20)   # weight/bias buffers + slack
    per_row = 2 * (K * in_itemsize + N * out_itemsize)             # double-buffered in + out rows
    tm_vmem = max(16, ((budget - fixed) // per_row) // 16 * 16)
    tm = max(16, _round_up(pl.cdiv(M, 4), 16))                     # >=4 grid steps when possible
    return min(tm, tm_vmem, tm_max, _round_up(M, 16))


def _linear_pallas(x2d, w_t, bias2d, *, out_dtype):
    """y = x2d @ w_t + bias2d.   x2d: (M, K), w_t: (K, N), bias2d: (1, N) f32."""
    M, K = x2d.shape
    N = w_t.shape[1]
    tm = _pick_row_tile(M, K, N,
                        jnp.dtype(x2d.dtype).itemsize,
                        jnp.dtype(out_dtype).itemsize,
                        jnp.dtype(w_t.dtype).itemsize)
    # No jnp.pad / slice-off: Pallas handles the partial last block (padded
    # read, masked writeback).  Each output row depends only on its own input
    # row, so garbage rows in the partial input tile are harmless.
    grid = (pl.cdiv(M, tm),)

    return pl.pallas_call(
        _linear_bias_kernel,
        out_shape=jax.ShapeDtypeStruct((M, N), out_dtype),
        grid_spec=pl.GridSpec(
            grid=grid,
            in_specs=[
                pl.BlockSpec((tm, K), lambda i: (i, 0)),   # row tile (double-buffered)
                pl.BlockSpec((K, N), lambda i: (0, 0)),    # resident weight
                pl.BlockSpec((1, N), lambda i: (0, 0)),    # resident bias
            ],
            out_specs=pl.BlockSpec((tm, N), lambda i: (i, 0)),
        ),
        compiler_params=pltpu.CompilerParams(
            dimension_semantics=("parallel",),             # megacore-shardable
            vmem_limit_bytes=_vmem_budget_bytes(),
        ),
    )(x2d, w_t, bias2d)


@jax.jit
def _spiral_forward_unfused(x, indices, w_t, bias2d):
    """Fallback: spiral gather in XLA (compute dtype), nn.Linear in Pallas."""
    bs, _, C = x.shape
    n_nodes, seq = indices.shape
    N = w_t.shape[1]
    # TODO(synk): this path still materializes the seq-times inflated gathered
    # activation in HBM (one write + one read); it is only used when the fused
    # in-kernel gather does not lower on this jax/libtpu version.
    x_g = jnp.take(x.astype(w_t.dtype), indices.reshape(-1), axis=1)
    x2d = x_g.reshape(bs * n_nodes, seq * C)
    y2d = _linear_pallas(x2d, w_t, bias2d, out_dtype=x.dtype)
    return y2d.reshape(bs, n_nodes, N)


# ---------------------------------------------------------------------------
# Fused gather + linear kernel (x, indices, W, b all resident in VMEM)
# ---------------------------------------------------------------------------
def _make_fused_kernel(n_nodes, seq, C, N, compute_dtype):
    def kernel(x_ref, idx_ref, w_ref, b_ref, o_ref):
        # x_ref:   (n_nodes, C)  x dtype (f32), one batch element, resident
        # idx_ref: (n_nodes, seq) int32, resident
        # w_ref:   (seq*C, N) compute dtype, resident;  b_ref: (1, N) f32
        # o_ref:   (n_nodes, N)
        x_b = x_ref[...]
        acc = jnp.zeros((n_nodes, N), jnp.float32)
        for s in range(seq):                 # seq is small & static -> unrolled
            idx_s = jnp.broadcast_to(idx_ref[:, s:s + 1], (n_nodes, C))
            # Dynamic row (sublane) gather: g[i, c] = x_b[indices[i, s], c].
            g = jnp.take_along_axis(x_b, idx_s, axis=0, mode="promise_in_bounds")
            acc = acc + jnp.dot(g.astype(compute_dtype),
                                w_ref[s * C:(s + 1) * C, :],
                                preferred_element_type=jnp.float32)
        o_ref[...] = (acc + b_ref[...]).astype(o_ref.dtype)
    return kernel


@jax.jit
def _spiral_forward_fused(x, indices, w_t, bias2d):
    """Fused spiral gather + linear: the gathered activation never hits HBM."""
    bs, _, C = x.shape
    n_nodes, seq = indices.shape
    K, N = w_t.shape
    kernel = _make_fused_kernel(n_nodes, seq, C, N, w_t.dtype)
    return pl.pallas_call(
        kernel,
        out_shape=jax.ShapeDtypeStruct((bs, n_nodes, N), x.dtype),
        grid_spec=pl.GridSpec(
            grid=(bs,),
            in_specs=[
                pl.BlockSpec((None, n_nodes, C), lambda b: (b, 0, 0)),  # x[b] resident
                pl.BlockSpec((n_nodes, seq), lambda b: (0, 0)),         # indices resident
                pl.BlockSpec((K, N), lambda b: (0, 0)),                 # weight resident
                pl.BlockSpec((1, N), lambda b: (0, 0)),                 # bias resident
            ],
            out_specs=pl.BlockSpec((None, n_nodes, N), lambda b: (b, 0, 0)),
        ),
        compiler_params=pltpu.CompilerParams(
            dimension_semantics=("parallel",),    # batch axis -> both v7x TCs
            vmem_limit_bytes=_vmem_budget_bytes(),
        ),
    )(x, indices, w_t, bias2d)


def _probe_fused_support(indices, in_channels, w_t, bias2d):
    """Compile + numerically validate the fused kernel once (bs=1) at the real
    (n_nodes, seq, C, N) configuration; fall back to the unfused path if the
    dynamic sublane gather does not lower (or miscompiles) on this stack."""
    try:
        n_nodes, seq = indices.shape
        x = jax.random.normal(jax.random.PRNGKey(1234),
                              (1, n_nodes, in_channels), jnp.float32)
        y = jax.block_until_ready(_spiral_forward_fused(x, indices, w_t, bias2d))
        x_g = jnp.take(x, indices.reshape(-1), axis=1).reshape(1, n_nodes, seq * in_channels)
        ref = (x_g.astype(w_t.dtype).astype(jnp.float32) @ w_t.astype(jnp.float32)
               + bias2d.astype(jnp.float32))
        ok = bool(jnp.all(jnp.isfinite(y)))
        ok = ok and bool(jnp.allclose(y.astype(jnp.float32), ref, atol=5e-2, rtol=5e-2))
        return ok
    except Exception:
        return False


# ---------------------------------------------------------------------------
# SpiralConv module (forward only; x.dim() in {2, 3})
# ---------------------------------------------------------------------------
class SpiralConv:
    def __init__(self, in_channels, out_channels, indices, dim=1, tsteps=1, *,
                 key, compute_dtype=jnp.bfloat16, use_fused="auto"):
        if dim != 1:
            raise NotImplementedError("only dim=1 (node axis) is supported")
        self.dim = dim
        self.indices = jnp.asarray(indices, jnp.int32)        # (n_nodes, seq_length)
        self.in_channels = in_channels
        self.out_channels = out_channels
        self.seq_length = self.indices.shape[1]
        if tsteps == 2:
            self.cycle = 1
        elif tsteps == 1:
            self.cycle = 0
        else:
            self.cycle = 2
        in_features = in_channels * (self.seq_length + self.cycle)

        n_nodes = self.indices.shape[0]
        # torch.index_select raises on out-of-range indices; jnp.take / the
        # in-kernel gather would be silent, so validate once up-front.
        if int(jnp.min(self.indices)) < 0 or int(jnp.max(self.indices)) >= n_nodes:
            raise ValueError("spiral indices out of range [0, n_nodes)")

        # reset_parameters(): xavier_uniform_ on weight, zeros on bias.
        bound = (6.0 / (in_features + out_channels)) ** 0.5
        self.weight = jax.random.uniform(
            key, (out_channels, in_features), jnp.float32, minval=-bound, maxval=bound)
        self.bias = jnp.zeros((out_channels,), jnp.float32)

        # Hoisted out of the forward: pre-transposed / pre-cast weight and a
        # (1, N) f32 bias (no per-call transpose/reshape/cast).  Use
        # compute_dtype=jnp.float32 for closer nn.Linear parity.
        self.compute_dtype = compute_dtype
        self._w_t = jnp.asarray(self.weight.T, compute_dtype)  # (K, N)
        self._bias2d = self.bias.reshape(1, out_channels)      # (1, N) f32

        # Fused gather+linear path selection (probe once, silent fallback).
        if use_fused == "auto":
            self._use_fused = self.cycle == 0 and _probe_fused_support(
                self.indices, in_channels, self._w_t, self._bias2d)
        else:
            self._use_fused = bool(use_fused)

    def _forward3d(self, x):
        if self._use_fused:
            return _spiral_forward_fused(x, self.indices, self._w_t, self._bias2d)
        return _spiral_forward_unfused(x, self.indices, self._w_t, self._bias2d)

    def __call__(self, x):
        if x.ndim == 2:
            # (n_nodes, C): identical math to the batched path with bs == 1.
            return self._forward3d(x[None])[0]
        if x.ndim == 3:
            return self._forward3d(x)
        if x.ndim == 4:
            # TODO(synk): x.dim()==4 temporal path (frame roll + concat gathers) not implemented.
            raise NotImplementedError("x.dim()==4 temporal path not implemented")
        raise RuntimeError(
            "x.dim() is expected to be 2, 3 and 4, but received {}".format(x.ndim))

    def __repr__(self):
        return "{}({}, {}, seq_length={})".format(
            self.__class__.__name__, self.in_channels, self.out_channels, self.seq_length)


# ---------------------------------------------------------------------------
def _reference(x, indices, weight, bias):
    bs = x.shape[0]
    n_nodes, seq = indices.shape
    x_g = jnp.take(x, indices.reshape(-1), axis=1).reshape(bs, n_nodes, -1)
    return x_g @ weight.T + bias


if __name__ == "__main__":
    key = jax.random.PRNGKey(0)
    k_x, k_idx, k_w = jax.random.split(key, 3)

    bs, n_nodes, in_channels = 2, 16, 4
    seq_length, out_channels = 9, 32

    indices = jax.random.randint(k_idx, (n_nodes, seq_length), 0, n_nodes, jnp.int32)
    x = jax.random.normal(k_x, (bs, n_nodes, in_channels), jnp.float32)

    # 3-D (batched) path, default bf16 MXU operands, auto fused/unfused selection.
    module = SpiralConv(in_channels, out_channels, indices, dim=1, tsteps=1, key=k_w)
    y = jax.block_until_ready(module(x))
    y_ref = _reference(x, indices, module.weight, module.bias)
    assert y.shape == (bs, n_nodes, out_channels)
    assert jnp.allclose(y, y_ref, atol=5e-2, rtol=5e-2), "mismatch vs f32 reference (3-D)"

    # 2-D (no batch) path.
    y2 = jax.block_until_ready(module(x[0]))
    assert jnp.allclose(y2, y_ref[0], atol=5e-2, rtol=5e-2), "mismatch vs f32 reference (2-D)"

    # f32 compute, forced unfused path, node count that does not divide the row
    # tile: exercises the pl.cdiv grid with a masked partial last block.
    n_odd = 23
    idx_odd = jax.random.randint(k_idx, (n_odd, seq_length), 0, n_odd, jnp.int32)
    x_odd = jax.random.normal(k_x, (bs, n_odd, in_channels), jnp.float32)
    mod_odd = SpiralConv(in_channels, out_channels, idx_odd, dim=1, tsteps=1, key=k_w,
                         compute_dtype=jnp.float32, use_fused=False)
    y_odd = jax.block_until_ready(mod_odd(x_odd))
    y_odd_ref = _reference(x_odd, idx_odd, mod_odd.weight, mod_odd.bias)
    assert y_odd.shape == (bs, n_odd, out_channels)
    assert jnp.allclose(y_odd, y_odd_ref, atol=5e-2, rtol=5e-2), "mismatch vs f32 reference (tail)"

    print("KERNEL_OK")
</pallas_src>

<mosaic_0001>
module attributes {stable_mosaic.version = 11 : i64} {
  func.func @kernel(%arg0: i32, %arg1: memref<1x16x4xf32, #tpu.memory_space<vmem>>, %arg2: memref<16x9xi32, #tpu.memory_space<vmem>>, %arg3: memref<36x32xbf16, #tpu.memory_space<vmem>>, %arg4: memref<1x32xf32, #tpu.memory_space<vmem>>, %arg5: memref<1x16x32xf32, #tpu.memory_space<vmem>>) attributes {dimension_semantics = [#tpu.dimension_semantics<parallel>], iteration_bounds = array<i64: 1>, scalar_prefetch = 0 : i64, scratch_operands = 0 : i64, tpu.core_type = #tpu.core_type<tc>, window_params = [{transform_indices = @transform_0, window_bounds = array<i64: 1, 16, 4>}, {pipeline_mode = #tpu.pipeline_mode<synchronous>, transform_indices = @transform_1, window_bounds = array<i64: 16, 9>}, {pipeline_mode = #tpu.pipeline_mode<synchronous>, transform_indices = @transform_2, window_bounds = array<i64: 36, 32>}, {pipeline_mode = #tpu.pipeline_mode<synchronous>, transform_indices = @transform_3, window_bounds = array<i64: 1, 32>}, {transform_indices = @transform_4, window_bounds = array<i64: 1, 16, 32>}]} {
    %c0 = arith.constant 0 : index
    %c0_0 = arith.constant 0 : index
    %c0_1 = arith.constant 0 : index
    %0 = vector.load %arg1[%c0, %c0_0, %c0_1] : memref<1x16x4xf32, #tpu.memory_space<vmem>>, vector<1x16x4xf32>
    %1 = vector.shape_cast %0 : vector<1x16x4xf32> to vector<16x4xf32>
    %cst = arith.constant 0.000000e+00 : f32
    %2 = vector.broadcast %cst : f32 to vector<16x32xf32>
    %c0_2 = arith.constant 0 : index
    %c0_3 = arith.constant 0 : index
    %3 = vector.load %arg2[%c0_2, %c0_3] : memref<16x9xi32, #tpu.memory_space<vmem>>, vector<16x1xi32>
    %4 = vector.shape_cast %3 : vector<16x1xi32> to vector<16x1xi32>
    %5 = vector.broadcast %4 : vector<16x1xi32> to vector<16x4xi32>
    %6 = vector.shape_cast %5 : vector<16x4xi32> to vector<16x4x1xi32>
    %7 = vector.shape_cast %6 : vector<16x4x1xi32> to vector<16x4xi32>
    %8 = tpu.dynamic_gather %1[%7] in [0] : vector<16x4xf32>, vector<16x4xi32> -> vector<16x4xf32>
    %9 = arith.truncf %8 : vector<16x4xf32> to vector<16x4xbf16>
    %c0_4 = arith.constant 0 : index
    %c0_5 = arith.constant 0 : index
    %10 = vector.load %arg3[%c0_4, %c0_5] : memref<36x32xbf16, #tpu.memory_space<vmem>>, vector<4x32xbf16>
    %cst_6 = arith.constant dense<0.000000e+00> : vector<16x32xf32>
    %11 = tpu.matmul %9, %10, %cst_6 {dimension_numbers = #tpu.dot_dimension_numbers<[1], [0], [0], [1], [0, 0, 1, 1], [], []>} : vector<16x4xbf16>, vector<4x32xbf16>, vector<16x32xf32> -> vector<16x32xf32>
    %12 = arith.addf %2, %11 : vector<16x32xf32>
    %c0_7 = arith.constant 0 : index
    %c1 = arith.constant 1 : index
    %13 = vector.load %arg2[%c0_7, %c1] : memref<16x9xi32, #tpu.memory_space<vmem>>, vector<16x1xi32>
    %14 = vector.shape_cast %13 : vector<16x1xi32> to vector<16x1xi32>
    %15 = vector.broadcast %14 : vector<16x1xi32> to vector<16x4xi32>
    %16 = vector.shape_cast %15 : vector<16x4xi32> to vector<16x4x1xi32>
    %17 = vector.shape_cast %16 : vector<16x4x1xi32> to vector<16x4xi32>
    %18 = tpu.dynamic_gather %1[%17] in [0] : vector<16x4xf32>, vector<16x4xi32> -> vector<16x4xf32>
    %19 = arith.truncf %18 : vector<16x4xf32> to vector<16x4xbf16>
    %c4 = arith.constant 4 : index
    %c0_8 = arith.constant 0 : index
    %20 = vector.load %arg3[%c4, %c0_8] : memref<36x32xbf16, #tpu.memory_space<vmem>>, vector<4x32xbf16>
    %cst_9 = arith.constant dense<0.000000e+00> : vector<16x32xf32>
    %21 = tpu.matmul %19, %20, %cst_9 {dimension_numbers = #tpu.dot_dimension_numbers<[1], [0], [0], [1], [0, 0, 1, 1], [], []>} : vector<16x4xbf16>, vector<4x32xbf16>, vector<16x32xf32> -> vector<16x32xf32>
    %22 = arith.addf %12, %21 : vector<16x32xf32>
    %c0_10 = arith.constant 0 : index
    %c2 = arith.constant 2 : index
    %23 = vector.load %arg2[%c0_10, %c2] : memref<16x9xi32, #tpu.memory_space<vmem>>, vector<16x1xi32>
    %24 = vector.shape_cast %23 : vector<16x1xi32> to vector<16x1xi32>
    %25 = vector.broadcast %24 : vector<16x1xi32> to vector<16x4xi32>
    %26 = vector.shape_cast %25 : vector<16x4xi32> to vector<16x4x1xi32>
    %27 = vector.shape_cast %26 : vector<16x4x1xi32> to vector<16x4xi32>
    %28 = tpu.dynamic_gather %1[%27] in [0] : vector<16x4xf32>, vector<16x4xi32> -> vector<16x4xf32>
    %29 = arith.truncf %28 : vector<16x4xf32> to vector<16x4xbf16>
    %c8 = arith.constant 8 : index
    %c0_11 = arith.constant 0 : index
    %30 = vector.load %arg3[%c8, %c0_11] : memref<36x32xbf16, #tpu.memory_space<vmem>>, vector<4x32xbf16>
    %cst_12 = arith.constant dense<0.000000e+00> : vector<16x32xf32>
    %31 = tpu.matmul %29, %30, %cst_12 {dimension_numbers = #tpu.dot_dimension_numbers<[1], [0], [0], [1], [0, 0, 1, 1], [], []>} : vector<16x4xbf16>, vector<4x32xbf16>, vector<16x32xf32> -> vector<16x32xf32>
    %32 = arith.addf %22, %31 : vector<16x32xf32>
    %c0_13 = arith.constant 0 : index
    %c3 = arith.constant 3 : index
    %33 = vector.load %arg2[%c0_13, %c3] : memref<16x9xi32, #tpu.memory_space<vmem>>, vector<16x1xi32>
    %34 = vector.shape_cast %33 : vector<16x1xi32> to vector<16x1xi32>
    %35 = vector.broadcast %34 : vector<16x1xi32> to vector<16x4xi32>
    %36 = vector.shape_cast %35 : vector<16x4xi32> to vector<16x4x1xi32>
    %37 = vector.shape_cast %36 : vector<16x4x1xi32> to vector<16x4xi32>
    %38 = tpu.dynamic_gather %1[%37] in [0] : vector<16x4xf32>, vector<16x4xi32> -> vector<16x4xf32>
    %39 = arith.truncf %38 : vector<16x4xf32> to vector<16x4xbf16>
    %c12 = arith.constant 12 : index
    %c0_14 = arith.constant 0 : index
    %40 = vector.load %arg3[%c12, %c0_14] : memref<36x32xbf16, #tpu.memory_space<vmem>>, vector<4x32xbf16>
    %cst_15 = arith.constant dense<0.000000e+00> : vector<16x32xf32>
    %41 = tpu.matmul %39, %40, %cst_15 {dimension_numbers = #tpu.dot_dimension_numbers<[1], [0], [0], [1], [0, 0, 1, 1], [], []>} : vector<16x4xbf16>, vector<4x32xbf16>, vector<16x32xf32> -> vector<16x32xf32>
    %42 = arith.addf %32, %41 : vector<16x32xf32>
    %c0_16 = arith.constant 0 : index
    %c4_17 = arith.constant 4 : index
    %43 = vector.load %arg2[%c0_16, %c4_17] : memref<16x9xi32, #tpu.memory_space<vmem>>, vector<16x1xi32>
    %44 = vector.shape_cast %43 : vector<16x1xi32> to vector<16x1xi32>
    %45 = vector.broadcast %44 : vector<16x1xi32> to vector<16x4xi32>
    %46 = vector.shape_cast %45 : vector<16x4xi32> to vector<16x4x1xi32>
    %47 = vector.shape_cast %46 : vector<16x4x1xi32> to vector<16x4xi32>
    %48 = tpu.dynamic_gather %1[%47] in [0] : vector<16x4xf32>, vector<16x4xi32> -> vector<16x4xf32>
    %49 = arith.truncf %48 : vector<16x4xf32> to vector<16x4xbf16>
    %c16 = arith.constant 16 : index
    %c0_18 = arith.constant 0 : index
    %50 = vector.load %arg3[%c16, %c0_18] : memref<36x32xbf16, #tpu.memory_space<vmem>>, vector<4x32xbf16>
    %cst_19 = arith.constant dense<0.000000e+00> : vector<16x32xf32>
    %51 = tpu.matmul %49, %50, %cst_19 {dimension_numbers = #tpu.dot_dimension_numbers<[1], [0], [0], [1], [0, 0, 1, 1], [], []>} : vector<16x4xbf16>, vector<4x32xbf16>, vector<16x32xf32> -> vector<16x32xf32>
    %52 = arith.addf %42, %51 : vector<16x32xf32>
    %c0_20 = arith.constant 0 : index
    %c5 = arith.constant 5 : index
    %53 = vector.load %arg2[%c0_20, %c5] : memref<16x9xi32, #tpu.memory_space<vmem>>, vector<16x1xi32>
    %54 = vector.shape_cast %53 : vector<16x1xi32> to vector<16x1xi32>
    %55 = vector.broadcast %54 : vector<16x1xi32> to vector<16x4xi32>
    %56 = vector.shape_cast %55 : vector<16x4xi32> to vector<16x4x1xi32>
    %57 = vector.shape_cast %56 : vector<16x4x1xi32> to vector<16x4xi32>
    %58 = tpu.dynamic_gather %1[%57] in [0] : vector<16x4xf32>, vector<16x4xi32> -> vector<16x4xf32>
    %59 = arith.truncf %58 : vector<16x4xf32> to vector<16x4xbf16>
    %c20 = arith.constant 20 : index
    %c0_21 = arith.constant 0 : index
    %60 = vector.load %arg3[%c20, %c0_21] : memref<36x32xbf16, #tpu.memory_space<vmem>>, vector<4x32xbf16>
    %cst_22 = arith.constant dense<0.000000e+00> : vector<16x32xf32>
    %61 = tpu.matmul %59, %60, %cst_22 {dimension_numbers = #tpu.dot_dimension_numbers<[1], [0], [0], [1], [0, 0, 1, 1], [], []>} : vector<16x4xbf16>, vector<4x32xbf16>, vector<16x32xf32> -> vector<16x32xf32>
    %62 = arith.addf %52, %61 : vector<16x32xf32>
    %c0_23 = arith.constant 0 : index
    %c6 = arith.constant 6 : index
    %63 = vector.load %arg2[%c0_23, %c6] : memref<16x9xi32, #tpu.memory_space<vmem>>, vector<16x1xi32>
    %64 = vector.shape_cast %63 : vector<16x1xi32> to vector<16x1xi32>
    %65 = vector.broadcast %64 : vector<16x1xi32> to vector<16x4xi32>
    %66 = vector.shape_cast %65 : vector<16x4xi32> to vector<16x4x1xi32>
    %67 = vector.shape_cast %66 : vector<16x4x1xi32> to vector<16x4xi32>
    %68 = tpu.dynamic_gather %1[%67] in [0] : vector<16x4xf32>, vector<16x4xi32> -> vector<16x4xf32>
    %69 = arith.truncf %68 : vector<16x4xf32> to vector<16x4xbf16>
    %c24 = arith.constant 24 : index
    %c0_24 = arith.constant 0 : index
    %70 = vector.load %arg3[%c24, %c0_24] : memref<36x32xbf16, #tpu.memory_space<vmem>>, vector<4x32xbf16>
    %cst_25 = arith.constant dense<0.000000e+00> : vector<16x32xf32>
    %71 = tpu.matmul %69, %70, %cst_25 {dimension_numbers = #tpu.dot_dimension_numbers<[1], [0], [0], [1], [0, 0, 1, 1], [], []>} : vector<16x4xbf16>, vector<4x32xbf16>, vector<16x32xf32> -> vector<16x32xf32>
    %72 = arith.addf %62, %71 : vector<16x32xf32>
    %c0_26 = arith.constant 0 : index
    %c7 = arith.constant 7 : index
    %73 = vector.load %arg2[%c0_26, %c7] : memref<16x9xi32, #tpu.memory_space<vmem>>, vector<16x1xi32>
    %74 = vector.shape_cast %73 : vector<16x1xi32> to vector<16x1xi32>
    %75 = vector.broadcast %74 : vector<16x1xi32> to vector<16x4xi32>
    %76 = vector.shape_cast %75 : vector<16x4xi32> to vector<16x4x1xi32>
    %77 = vector.shape_cast %76 : vector<16x4x1xi32> to vector<16x4xi32>
    %78 = tpu.dynamic_gather %1[%77] in [0] : vector<16x4xf32>, vector<16x4xi32> -> vector<16x4xf32>
    %79 = arith.truncf %78 : vector<16x4xf32> to vector<16x4xbf16>
    %c28 = arith.constant 28 : index
    %c0_27 = arith.constant 0 : index
    %80 = vector.load %arg3[%c28, %c0_27] : memref<36x32xbf16, #tpu.memory_space<vmem>>, vector<4x32xbf16>
    %cst_28 = arith.constant dense<0.000000e+00> : vector<16x32xf32>
    %81 = tpu.matmul %79, %80, %cst_28 {dimension_numbers = #tpu.dot_dimension_numbers<[1], [0], [0], [1], [0, 0, 1, 1], [], []>} : vector<16x4xbf16>, vector<4x32xbf16>, vector<16x32xf32> -> vector<16x32xf32>
    %82 = arith.addf %72, %81 : vector<16x32xf32>
    %c0_29 = arith.constant 0 : index
    %c8_30 = arith.constant 8 : index
    %83 = vector.load %arg2[%c0_29, %c8_30] : memref<16x9xi32, #tpu.memory_space<vmem>>, vector<16x1xi32>
    %84 = vector.shape_cast %83 : vector<16x1xi32> to vector<16x1xi32>
    %85 = vector.broadcast %84 : vector<16x1xi32> to vector<16x4xi32>
    %86 = vector.shape_cast %85 : vector<16x4xi32> to vector<16x4x1xi32>
    %87 = vector.shape_cast %86 : vector<16x4x1xi32> to vector<16x4xi32>
    %88 = tpu.dynamic_gather %1[%87] in [0] : vector<16x4xf32>, vector<16x4xi32> -> vector<16x4xf32>
    %89 = arith.truncf %88 : vector<16x4xf32> to vector<16x4xbf16>
    %c32 = arith.constant 32 : index
    %c0_31 = arith.constant 0 : index
    %90 = vector.load %arg3[%c32, %c0_31] : memref<36x32xbf16, #tpu.memory_space<vmem>>, vector<4x32xbf16>
    %cst_32 = arith.constant dense<0.000000e+00> : vector<16x32xf32>
    %91 = tpu.matmul %89, %90, %cst_32 {dimension_numbers = #tpu.dot_dimension_numbers<[1], [0], [0], [1], [0, 0, 1, 1], [], []>} : vector<16x4xbf16>, vector<4x32xbf16>, vector<16x32xf32> -> vector<16x32xf32>
    %92 = arith.addf %82, %91 : vector<16x32xf32>
    %c0_33 = arith.constant 0 : index
    %c0_34 = arith.constant 0 : index
    %93 = vector.load %arg4[%c0_33, %c0_34] : memref<1x32xf32, #tpu.memory_space<vmem>>, vector<1x32xf32>
    %94 = vector.broadcast %93 : vector<1x32xf32> to vector<16x32xf32>
    %95 = arith.addf %92, %94 : vector<16x32xf32>
    %c0_35 = arith.constant 0 : index
    %c0_36 = arith.constant 0 : index
    %c0_37 = arith.constant 0 : index
    %96 = vector.load %arg5[%c0_35, %c0_36, %c0_37] : memref<1x16x32xf32, #tpu.memory_space<vmem>>, vector<1x16x32xf32>
    %97 = vector.shape_cast %96 : vector<1x16x32xf32> to vector<16x32xf32>
    %98 = vector.shape_cast %95 : vector<16x32xf32> to vector<1x16x32xf32>
    tpu.vector_store %arg5[%c0_35, %c0_36, %c0_37], %98 {strides = array<i32>} : memref<1x16x32xf32, #tpu.memory_space<vmem>>, vector<1x16x32xf32>,
    return
  }
  func.func @transform_0(%arg0: i32) -> (i32, i32, i32) {
    %c0_i32 = arith.constant 0 : i32
    %c0_i32_0 = arith.constant 0 : i32
    %c0_i32_1 = arith.constant 0 : i32
    return %arg0, %c0_i32, %c0_i32_0 : i32, i32, i32
  }
  func.func @transform_1(%arg0: i32) -> (i32, i32) {
    %c0_i32 = arith.constant 0 : i32
    %c0_i32_0 = arith.constant 0 : i32
    %c0_i32_1 = arith.constant 0 : i32
    return %c0_i32, %c0_i32_0 : i32, i32
  }
  func.func @transform_2(%arg0: i32) -> (i32, i32) {
    %c0_i32 = arith.constant 0 : i32
    %c0_i32_0 = arith.constant 0 : i32
    %c0_i32_1 = arith.constant 0 : i32
    return %c0_i32, %c0_i32_0 : i32, i32
  }
  func.func @transform_3(%arg0: i32) -> (i32, i32) {
    %c0_i32 = arith.constant 0 : i32
    %c0_i32_0 = arith.constant 0 : i32
    %c0_i32_1 = arith.constant 0 : i32
    return %c0_i32, %c0_i32_0 : i32, i32
  }
  func.func @transform_4(%arg0: i32) -> (i32, i32, i32) {
    %c0_i32 = arith.constant 0 : i32
    %c0_i32_0 = arith.constant 0 : i32
    %c0_i32_1 = arith.constant 0 : i32
    return %arg0, %c0_i32, %c0_i32_0 : i32, i32, i32
  }
}

module attributes {stable_mosaic.version = 11 : i64} {
  func.func @_linear_bias_kernel(%arg0: i32, %arg1: memref<16x36xbf16, #tpu.memory_space<vmem>>, %arg2: memref<36x32xbf16, #tpu.memory_space<vmem>>, %arg3: memref<1x32xf32, #tpu.memory_space<vmem>>, %arg4: memref<16x32xf32, #tpu.memory_space<vmem>>) attributes {dimension_semantics = [#tpu.dimension_semantics<parallel>], iteration_bounds = array<i64: 2>, scalar_prefetch = 0 : i64, scratch_operands = 0 : i64, tpu.core_type = #tpu.core_type<tc>, window_params = [{transform_indices = @transform_0, window_bounds = array<i64: 16, 36>}, {pipeline_mode = #tpu.pipeline_mode<synchronous>, transform_indices = @transform_1, window_bounds = array<i64: 36, 32>}, {pipeline_mode = #tpu.pipeline_mode<synchronous>, transform_indices = @transform_2, window_bounds = array<i64: 1, 32>}, {transform_indices = @transform_3, window_bounds = array<i64: 16, 32>}]} {
    %c0 = arith.constant 0 : index
    %c0_0 = arith.constant 0 : index
    %0 = vector.load %arg1[%c0, %c0_0] : memref<16x36xbf16, #tpu.memory_space<vmem>>, vector<16x36xbf16>
    %c0_1 = arith.constant 0 : index
    %c0_2 = arith.constant 0 : index
    %1 = vector.load %arg2[%c0_1, %c0_2] : memref<36x32xbf16, #tpu.memory_space<vmem>>, vector<36x32xbf16>
    %cst = arith.constant dense<0.000000e+00> : vector<16x32xf32>
    %2 = tpu.matmul %0, %1, %cst {dimension_numbers = #tpu.dot_dimension_numbers<[1], [0], [0], [1], [0, 0, 1, 1], [], []>} : vector<16x36xbf16>, vector<36x32xbf16>, vector<16x32xf32> -> vector<16x32xf32>
    %c0_3 = arith.constant 0 : index
    %c0_4 = arith.constant 0 : index
    %3 = vector.load %arg3[%c0_3, %c0_4] : memref<1x32xf32, #tpu.memory_space<vmem>>, vector<1x32xf32>
    %4 = vector.broadcast %3 : vector<1x32xf32> to vector<16x32xf32>
    %5 = arith.addf %2, %4 : vector<16x32xf32>
    %c0_5 = arith.constant 0 : index
    %c0_6 = arith.constant 0 : index
    %6 = vector.load %arg4[%c0_5, %c0_6] : memref<16x32xf32, #tpu.memory_space<vmem>>, vector<16x32xf32>
    tpu.vector_store %arg4[%c0_5, %c0_6], %5 {strides = array<i32>} : memref<16x32xf32, #tpu.memory_space<vmem>>, vector<16x32xf32>,
    return
  }
  func.func @transform_0(%arg0: i32) -> (i32, i32) {
    %c0_i32 = arith.constant 0 : i32
    %c0_i32_0 = arith.constant 0 : i32
    return %arg0, %c0_i32 : i32, i32
  }
  func.func @transform_1(%arg0: i32) -> (i32, i32) {
    %c0_i32 = arith.constant 0 : i32
    %c0_i32_0 = arith.constant 0 : i32
    %c0_i32_1 = arith.constant 0 : i32
    return %c0_i32, %c0_i32_0 : i32, i32
  }
  func.func @transform_2(%arg0: i32) -> (i32, i32) {
    %c0_i32 = arith.constant 0 : i32
    %c0_i32_0 = arith.constant 0 : i32
    %c0_i32_1 = arith.constant 0 : i32
    return %c0_i32, %c0_i32_0 : i32, i32
  }
  func.func @transform_3(%arg0: i32) -> (i32, i32) {
    %c0_i32 = arith.constant 0 : i32
    %c0_i32_0 = arith.constant 0 : i32
    return %arg0, %c0_i32 : i32, i32
  }
}

</mosaic_0001>

<bundles_post_ra>
// kernel: _spiral_forward_unfused.1
= control target key start
LH: loop header
LB: loop body
LE: loop exit
PB: predicated region body
PF: predicated region fallthrough
CT: control target
= control target key end

     0   :  { %8 = vsyncpa [#allocation3], 0  ;;  %s618_s0 = inlined_call_operand.vmem [shape: bf16[32,36], index: 0, kind: input, shape index: {}]   ;;  %s619_s1 = inlined_call_operand.vmem [shape: bf16[36,32], index: 1, kind: input, shape index: {}]   ;;  %s620_s2 = inlined_call_operand.vmem [shape: f32[1,32], index: 2, kind: input, shape index: {}]   ;;  %s621_s3 = inlined_call_operand.hbm [shape: f32[32,32], index: 3, kind: output, shape index: {}]  }
   0x1   :  { %10 = vsyncpa [#allocation3 + $0x1], 0  ;;  %s504_s12 = smov 0   ;;  %s506_s13 = smov 0  }
   0x2   :  { %s508_s14 = smov 0   ;;  %s510_s15 = smov 0  }
   0x3 LB: > { %s525_s16 = sadd.s32 4294967295, %s477_s15   ;;  %s335_s17 = sadd.s32 4294967294, %s477_s15   ;;  %s477_s15 = sphi %s510_s15, %s627_s15   ;;  %s473_s14 = sphi %s508_s14, %s626_s14   ;;  %s469_s13 = sphi %s506_s13, %s625_s13   ;;  %s465_s12 = sphi %s504_s12, %s624_s12  }
   0x4   : > { %s529_s18 = sadd.s32 1, %s477_s15   ;;  %s91_s19 = sadd.s32 1, %s473_s14 }
   0x5   : > { %s88_s20 = ssub.s32 %s477_s15, %s529_s18  ;;  %p101_p0 = scmp.ne.s32.totalorder %s473_s14, %s469_s13 }
   0x6   : > { %p89_p1 = scmp.eq.s32.totalorder %s88_s20, 0  ;;  %p102_p2 = scmp.eq.s32.totalorder %s525_s16, 1 }
   0x7   : > { %p107_p3 = scmp.ne.s32.totalorder %s469_s13, %s465_s12  ;;  %p108_p4 = scmp.eq.s32.totalorder %s335_s17, 1 }
   0x8   : > { %s540_s21 = scalar_select %p89_p1, %s473_s14, %s91_s19  }
   0x9   : > { %p542_p5 = por %p102_p2, %p101_p0  ;;  %p546_p6 = por %p108_p4, %p107_p3 }
   0xa   : > { %p338_p7 = scmp.ge.s32.totalorder %s477_s15, 1  ;;  %p141_p8 = scmp.lt.s32.totalorder %s477_s15, 3 }
   0xc   : > { %p142_p9 = pnand %p338_p7, %p141_p8 }
   0xd   : > { %v411_v0 = vld [vmem:[%s619_s1] sm:$0xff] (!%p142_p9)   ;;  %v479_v1 = vmov (!%p142_p9), 0.0   ;;  %v412_v2 = vld [vmem:[%s619_s1 + $0x8] sm:$0xff] (!%p142_p9)   ;;  %v413_v3 = vld [vmem:[%s619_s1 + $0x10] ss:$0 sps:$4 sm:$0x33] (!%p142_p9)  }
   0xe   : > { %145 = sbr.rel (%p142_p9) target bundleno = 257 (0x101), region = 32  ;;  %358 = vmatprep.subr.bf16.mxu0 (!%p142_p9), %v479_v1  ;;  %vm480_vm0 = vmmov (!%p142_p9), 0   ;;  %s340_s30 = sshll.u32 (!%p142_p9), %s525_s16, 1  ;;  %vm211_vm1 = vcmask (!%p142_p9), 1041408   ;;  %vm207_vm2 = vcmask (!%p142_p9), 293888   ;;  %vm256_vm3 = vcmask (!%p142_p9), 261120  }
   0xf   : > { %359 = vmatpush3.bf16.msra.mxu0 (!%p142_p9), %v411_v0  ;;  %364 = vmatprep.mubr.msk.bf16.mxu0 (!%p142_p9), %vm480_vm0, %v479_v1  ;;  %p166_p10 = scmp.lt.s32.totalorder (!%p142_p9), %s340_s30, 3  ;;  %v213_v4 = vsel (!%p142_p9), %vm211_vm1, %v413_v3, 0  ;;  %s162_s8 = sand.u32 (!%p142_p9), 1, %s469_s13   ;;  %v342_v6 = vld [vmem:[%s620_s2] ss:$0 sm:$0xff] (!%p142_p9) }
  0x10   : > { %360 = vmatprep.subr.bf16.mxu0 (!%p142_p9), %v479_v1  ;;  %s339_s9 = sshll.u32 (!%p142_p9), %s162_s8, 4  ;;  %s353_s20 = sshll.u32 (!%p142_p9), %s525_s16, 8 }
  0x11   : > { %s164_s17 = scalar_lea.vmem (!%p142_p9), [#allocation2], %s339_s9  ;;  %s575_s26 = scalar_lea.hbm (!%p142_p9), %s621_s3, %s353_s20 }
  0x12   : > { %s273_s19 = sshll.u32 (!%p142_p9), %s164_s17, 4  ;;  %s577_s16 = scalar_lea.sflag (!%p142_p9), [#allocation3], %s162_s8  ;;  %s570_s19 = int_to_ptr.vmem [resolvable:$true] %s273_s19 }
  0x13   : > { %361 = vmatpush3.bf16.msra.mxu0 (!%p142_p9), %v412_v2  ;;  %s415_s27 = scalar_lea.vmem (!%p142_p9), %s570_s19, 256  ;;  %s481_s28 = smov (!%p142_p9), [#allocation2]  }
  0x14   : > { %362 = vmatprep.subr.bf16.mxu0 (!%p142_p9), %v479_v1  ;;  %p416_p11 = scmp.ne.s32.totalorder (!%p142_p9), %s570_s19, %s415_s27  ;;  %s419_s29 = sshll.u32 (!%p142_p9), %s481_s28, 4  ;;  %s420_s29 = int_to_ptr.vmem [resolvable:$false] %s419_s29 }
  0x15   : > { %s629_s30 = smov (!%p166_p10, %s340_s30), 3  ;;  %p422_p0 = scmp.lt.s32.totalorder %s570_s19, %s420_s29 }
  0x16   : > { %s341_s4 = sshll.u32 %s629_s30, 2  ;;  %p417_p12 = pnand %p416_p11, %p542_p5 }
  0x17   : > { %s169_s7 = scalar_lea.vmem %s618_s0, %s341_s4  ;;  %363 = vmatpush3.bf16.msra.mxu0 %v213_v4  ;;  %s421_s30 = scalar_lea.vmem %s420_s29, 512 }
  0x18   : > { %v414_v5 = vld [vmem:[%s169_s7] sm:$0xff]   ;;  %p418_p13 = pneg %p417_p12  ;;  %p423_p1 = scmp.lt.s32.totalorder %s421_s30, %s415_s27 }
  0x1a   : > { %365 = vmatmul.mubr.msk.bf16.vlgmr.msra.gmra.mrb[0].mxu0 %vm207_vm2, %v414_v5  ;;  %p424_p2 = por %p423_p1, %p422_p0 }
  0x1c   : > { %p425_p3 = pnand %p424_p2, %p418_p13 }
  0xed   : > { %v249_v7 = vpop.f32.mrb[0].mxu0 }
  0xee   : > { %v250_v8 = vadd.f32 %v342_v6, %v249_v7  ;;  %v366_v9 = vpop.f32.mrb[1].mxu0 }
  0xef   : > { %v252_v10 = vpop.f32.mrb[2].mxu0 }
  0xf0   : > { %257 = vst.msk [vmem:[%s164_s17] sm:$0xff] %vm256_vm3, %v250_v8  ;;  %v253_v11 = vadd.f32 %v342_v6, %v252_v10  ;;  %v367_v12 = vpop.f32.mrb[3].mxu0 }
  0xf2   : > { %258 = vst.msk [vmem:[%s164_s17 + $0x8] sm:$0xff] %vm256_vm3, %v253_v11 }
  0xf3   : > { %428 = shalt.err (!%p425_p3)
}
  0xf4   : > { %s429_s4 = scalar_lea.hbm %s575_s26, 256  ;;  %s433_s7 = scalar_lea.hbm %s621_s3, 512 }
  0xf5   : > { %p430_p4 = scmp.ne.s32.totalorder %s575_s26, %s429_s4  ;;  %p434_p9 = scmp.lt.u32.totalorder %s575_s26, %s621_s3 }
  0xf6   : > { %p435_p10 = scmp.lt.u32.totalorder %s433_s7, %s429_s4  ;;  %p437_p12 = scmp.lt.u32.totalorder %s429_s4, %s575_s26 }
  0xf7   : > { %p431_p7 = pnand %p430_p4, %p542_p5 }
  0xf8   : > { %p436_p11 = por %p435_p10, %p434_p9 }
  0xf9   : > { %p432_p8 = pneg %p431_p7 }
  0xfa   : > { %p438_p13 = por %p437_p12, %p436_p11 }
  0xfc   : > { %p439_p0 = pnand %p438_p13, %p432_p8 }
  0xfe   : > { %442 = shalt.err (!%p439_p0)
}
  0xff   : > { %s482_s10 = smov 128   ;;  %s483_s11 = smov 8  }
 0x100   : > { %368 = dma.vmem_to_hbm [thread:$0]  (%p542_p5), %s570_s19, 256, %s575_s26, %s577_s16, %s482_s10, %s482_s10, %s483_s11  }
 0x101 PF: > { %p374_p1 = scmp.ge.s32.totalorder %s477_s15, 2  ;;  %s288_s17 = sand.u32 1, %s465_s12  }
 0x102   : > { %s289_s20 = scalar_lea.sflag [#allocation3], %s288_s17 }
 0x103   : > { %p371_p2 = pnand %p374_p1, %p546_p6 }
 0x105   : > { %460 = dma.done.wait (!%p371_p2), %s289_s20, 256  }
 0x106   : > { %462 = vsyncadd (!%p371_p2), %s289_s20, 4294967040  ;;  %p13_p3 = scmp.ge.s32.totalorder %s529_s18, 4   ;;  %s624_s12 = smov %s469_s13 }
 0x107   : > { %s625_s13 = smov %s473_s14  ;;  %s626_s14 = smov %s540_s21 }
 0x108   : > { %s627_s15 = smov %s529_s18  ;;  %15 = sbr.rel (!%p13_p3) target bundleno = 3 (0x3), region = 67 }
 0x10f   :  { %294 = vsyncpa [#allocation3], 1 }
 0x110   :  { %296 = vsyncpa [#allocation3 + $0x1], 1 }

</bundles_post_ra>
